<compile_context>
chip_gen: v5e
topology: v5e:2x2
jax: 0.10.0
libtpu: 0.0.40
codegen_flags: <defaults>
</compile_context>

<pallas_src>
import jax
import jax.numpy as jnp
from jax.experimental import pallas as pl
from jax.experimental.pallas import tpu as pltpu


def _round_up(x, m):
    return ((x + m - 1) // m) * m


def _qnet_kernel(x_ref, w1_ref, b1_ref, w2_ref, b2_ref, w3r_ref, b3_ref,
                 out_ref):
    # x:   (TB, d_in)  activations, batch rows on sublanes   (compute dtype)
    # w1:  (d_in, Hp)  w2: (Hp, Hp)                          (compute dtype)
    # b1/b2/w3r: (1, Hp) f32,  b3: (1, 1) f32 scalar in SMEM
    # out: (1, TB//128, 128) f32  -- lane-dense relayout of the Q column.
    h1 = jnp.dot(x_ref[...], w1_ref[...], preferred_element_type=jnp.float32)
    h1 = jnp.maximum(h1 + b1_ref[...], 0.0)

    h2 = jnp.dot(h1.astype(w2_ref.dtype), w2_ref[...],
                 preferred_element_type=jnp.float32)
    h2 = jnp.maximum(h2 + b2_ref[...], 0.0)

    # Final layer (Hp -> 1): VPU multiply + XLU lane reduce (slots overlap the
    # MXU work) on a (rows, 128, Hp) view of h2, so the result is already
    # lane-dense: 128 q-values per vreg row -> unmasked stores + one
    # contiguous output DMA per tile.
    p = h2 * w3r_ref[...]                              # (TB, Hp) f32
    _, rows, lanes = out_ref.shape                     # (1, TB//128, 128)
    p3 = p.reshape(rows, lanes, p.shape[-1])           # leading-dim split
    q = jnp.sum(p3, axis=-1) + b3_ref[0, 0]            # (rows, 128)
    out_ref[...] = q.reshape(out_ref.shape).astype(out_ref.dtype)


def qnet_forward(obs, act, params, *, compute_dtype=jnp.float32, tile_b=2048):
    """obs: [B, obs_dim], act: [B, act_dim] -> Q: [B] (float32).

    compute_dtype: storage / MXU-input dtype for the activation stream and the
    two big weight matrices.  float32 matches the PyTorch module; bfloat16
    halves the dominant HBM stream (accumulation, biases, ReLU and the final
    layer stay f32) and is recommended on v6e/v7x.
    tile_b: target batch-tile size.  2048 fits v5e's 16 MiB scoped-VMEM
    default; raise to 4096-8192 on v6e/v7x to amortize per-step overhead.
    """
    w1, b1, w2, b2, w3, b3 = params
    B, obs_dim = obs.shape
    act_dim = act.shape[1]
    d_in = obs_dim + act_dim
    H = w2.shape[0]
    cd = jnp.dtype(compute_dtype)

    # --- merge obs/act into one activation stream (single W1 matmul) --------
    x = jnp.concatenate([obs, act], axis=-1).astype(cd)          # [B, d_in]

    # --- weights / biases; pad hidden dim to a lane multiple (free) ---------
    Hp = _round_up(H, 128)
    w1c = w1.astype(cd)
    w2c = w2.astype(cd)
    b1f = b1.reshape(1, H).astype(jnp.float32)
    b2f = b2.reshape(1, H).astype(jnp.float32)
    w3r = w3.reshape(1, H).astype(jnp.float32)
    b3f = jnp.asarray(b3, jnp.float32).reshape(1, 1)
    if Hp != H:
        w1c = jnp.pad(w1c, ((0, 0), (0, Hp - H)))
        w2c = jnp.pad(w2c, ((0, Hp - H), (0, Hp - H)))
        b1f = jnp.pad(b1f, ((0, 0), (0, Hp - H)))
        b2f = jnp.pad(b2f, ((0, 0), (0, Hp - H)))
        w3r = jnp.pad(w3r, ((0, 0), (0, Hp - H)))

    # --- batch tiling: minimal padding, 128-row aligned, >=2 tiles when the
    #     batch allows (so v7x's "parallel" axis actually shards 2 TCs) ------
    num_tiles = pl.cdiv(B, int(tile_b))
    if B >= 256:
        num_tiles = max(num_tiles, 2)
    TB = _round_up(pl.cdiv(B, num_tiles), 128)
    num_tiles = pl.cdiv(B, TB)
    B_pad = TB * num_tiles
    if B_pad != B:
        x = jnp.pad(x, ((0, B_pad - B), (0, 0)))

    rows = TB // 128

    flops = 2 * B_pad * (d_in * Hp + Hp * Hp + Hp)
    bytes_accessed = (
        B_pad * d_in * cd.itemsize                 # activation stream in
        + B_pad * 4                                # q out (f32, lane-dense)
        + (d_in * Hp + Hp * Hp) * cd.itemsize      # big weights
        + (3 * Hp + 1) * 4                         # biases + w3 row (f32)
    )

    out = pl.pallas_call(
        _qnet_kernel,
        out_shape=jax.ShapeDtypeStruct((num_tiles, rows, 128), jnp.float32),
        grid=(num_tiles,),
        in_specs=[
            # Batch-tiled merged activation stream.
            pl.BlockSpec((TB, d_in), lambda i: (i, 0)),
            # Weights/biases: constant block index -> resident in VMEM.
            pl.BlockSpec((d_in, Hp), lambda i: (0, 0)),
            pl.BlockSpec((1, Hp), lambda i: (0, 0)),
            pl.BlockSpec((Hp, Hp), lambda i: (0, 0)),
            pl.BlockSpec((1, Hp), lambda i: (0, 0)),
            pl.BlockSpec((1, Hp), lambda i: (0, 0)),
            # b3 is a single f32 scalar -> SMEM, not a whole vreg tile.
            pl.BlockSpec(memory_space=pltpu.MemorySpace.SMEM),
        ],
        # Lane-dense output block: (rows, 128) per tile.
        out_specs=pl.BlockSpec((1, rows, 128), lambda i: (i, 0, 0)),
        compiler_params=pltpu.CompilerParams(
            dimension_semantics=("parallel",)),     # 2x on v7x's two TCs
        cost_estimate=pl.CostEstimate(
            flops=int(flops), transcendentals=0,
            bytes_accessed=int(bytes_accessed)),
    )(x, w1c, b1f, w2c, b2f, w3r, b3f)

    return out.reshape(-1)[:B]   # drop batch padding + squeeze(-1)


def init_qnet_params(key, obs_dim, act_dim, hidden_size):
    """Deterministic init mimicking torch.nn.Linear default U(-1/sqrt(fan_in), +)."""
    d_in = obs_dim + act_dim
    ks = jax.random.split(key, 6)

    def lin(kw, kb, fan_in, fan_out):
        bound = 1.0 / jnp.sqrt(jnp.float32(fan_in))
        w = jax.random.uniform(kw, (fan_in, fan_out), jnp.float32, -bound, bound)
        b = jax.random.uniform(kb, (fan_out,), jnp.float32, -bound, bound)
        return w, b

    w1, b1 = lin(ks[0], ks[1], d_in, hidden_size)
    w2, b2 = lin(ks[2], ks[3], hidden_size, hidden_size)
    w3, b3 = lin(ks[4], ks[5], hidden_size, 1)
    return (w1, b1, w2, b2, w3.reshape(hidden_size), b3.reshape(()))


def _reference(obs, act, params):
    """Plain-JAX f32 reference matching the PyTorch forward."""
    w1, b1, w2, b2, w3, b3 = params
    x = jnp.concatenate([obs, act], axis=-1)
    h = jnp.maximum(x @ w1 + b1, 0.0)
    h = jnp.maximum(h @ w2 + b2, 0.0)
    return h @ w3 + b3


if __name__ == "__main__":
    obs_dim, act_dim, hidden_size, batch = 8, 4, 32, 8

    key = jax.random.PRNGKey(0)
    k_obs, k_act, k_params = jax.random.split(key, 3)

    obs = jax.random.normal(k_obs, (batch, obs_dim), jnp.float32)
    act = jax.random.normal(k_act, (batch, act_dim), jnp.float32)
    params = init_qnet_params(k_params, obs_dim, act_dim, hidden_size)

    # 1) f32 path (matches the PyTorch module numerics).
    q = qnet_forward(obs, act, params)
    jax.block_until_ready(q)
    q_ref = _reference(obs, act, params)
    assert q.shape == (batch,)
    assert jnp.allclose(q, q_ref, atol=1e-5, rtol=1e-5)

    # 2) Ragged batch + multi-tile grid (padding, resident weights, >=2 tiles).
    b2_ = 300
    k_o2, k_a2 = jax.random.split(jax.random.PRNGKey(1))
    obs2 = jax.random.normal(k_o2, (b2_, obs_dim), jnp.float32)
    act2 = jax.random.normal(k_a2, (b2_, act_dim), jnp.float32)
    q2 = qnet_forward(obs2, act2, params, tile_b=128)   # grid of 3 tiles
    jax.block_until_ready(q2)
    assert q2.shape == (b2_,)
    assert jnp.allclose(q2, _reference(obs2, act2, params), atol=1e-5, rtol=1e-5)

    # 3) bf16 storage path (bandwidth optimization for v6e/v7x), looser check.
    q_bf16 = qnet_forward(obs, act, params, compute_dtype=jnp.bfloat16)
    jax.block_until_ready(q_bf16)
    assert jnp.allclose(q_bf16, q_ref, atol=5e-2, rtol=5e-2)

    print("KERNEL_OK")
</pallas_src>

<mosaic_0001>
module attributes {stable_mosaic.version = 11 : i64} {
  func.func @_qnet_kernel(%arg0: i32, %arg1: memref<128x12xf32, #tpu.memory_space<vmem>>, %arg2: memref<12x128xf32, #tpu.memory_space<vmem>>, %arg3: memref<1x128xf32, #tpu.memory_space<vmem>>, %arg4: memref<128x128xf32, #tpu.memory_space<vmem>>, %arg5: memref<1x128xf32, #tpu.memory_space<vmem>>, %arg6: memref<1x128xf32, #tpu.memory_space<vmem>>, %arg7: memref<1x1xf32, #tpu.memory_space<smem>>, %arg8: memref<1x1x128xf32, #tpu.memory_space<vmem>>) attributes {dimension_semantics = [#tpu.dimension_semantics<parallel>], iteration_bounds = array<i64: 1>, scalar_prefetch = 0 : i64, scratch_operands = 0 : i64, tpu.core_type = #tpu.core_type<tc>, window_params = [{transform_indices = @transform_0, window_bounds = array<i64: 128, 12>}, {pipeline_mode = #tpu.pipeline_mode<synchronous>, transform_indices = @transform_1, window_bounds = array<i64: 12, 128>}, {pipeline_mode = #tpu.pipeline_mode<synchronous>, transform_indices = @transform_2, window_bounds = array<i64: 1, 128>}, {pipeline_mode = #tpu.pipeline_mode<synchronous>, transform_indices = @transform_3, window_bounds = array<i64: 128, 128>}, {pipeline_mode = #tpu.pipeline_mode<synchronous>, transform_indices = @transform_4, window_bounds = array<i64: 1, 128>}, {pipeline_mode = #tpu.pipeline_mode<synchronous>, transform_indices = @transform_5, window_bounds = array<i64: 1, 128>}, {transform_indices = @transform_6, window_bounds = array<i64: 1, 1>}, {transform_indices = @transform_7, window_bounds = array<i64: 1, 1, 128>}]} {
    %c0 = arith.constant 0 : index
    %c0_0 = arith.constant 0 : index
    %0 = vector.load %arg1[%c0, %c0_0] : memref<128x12xf32, #tpu.memory_space<vmem>>, vector<128x12xf32>
    %c0_1 = arith.constant 0 : index
    %c0_2 = arith.constant 0 : index
    %1 = vector.load %arg2[%c0_1, %c0_2] : memref<12x128xf32, #tpu.memory_space<vmem>>, vector<12x128xf32>
    %cst = arith.constant dense<0.000000e+00> : vector<128x128xf32>
    %2 = tpu.matmul %0, %1, %cst {dimension_numbers = #tpu.dot_dimension_numbers<[1], [0], [0], [1], [0, 0, 1, 1], [], []>} : vector<128x12xf32>, vector<12x128xf32>, vector<128x128xf32> -> vector<128x128xf32>
    %c0_3 = arith.constant 0 : index
    %c0_4 = arith.constant 0 : index
    %3 = vector.load %arg3[%c0_3, %c0_4] : memref<1x128xf32, #tpu.memory_space<vmem>>, vector<1x128xf32>
    %4 = vector.broadcast %3 : vector<1x128xf32> to vector<128x128xf32>
    %5 = arith.addf %2, %4 : vector<128x128xf32>
    %cst_5 = arith.constant 0.000000e+00 : f32
    %6 = vector.broadcast %cst_5 : f32 to vector<128x128xf32>
    %7 = arith.maximumf %5, %6 : vector<128x128xf32>
    %c0_6 = arith.constant 0 : index
    %c0_7 = arith.constant 0 : index
    %8 = vector.load %arg4[%c0_6, %c0_7] : memref<128x128xf32, #tpu.memory_space<vmem>>, vector<128x128xf32>
    %cst_8 = arith.constant dense<0.000000e+00> : vector<128x128xf32>
    %9 = tpu.matmul %7, %8, %cst_8 {dimension_numbers = #tpu.dot_dimension_numbers<[1], [0], [0], [1], [0, 0, 1, 1], [], []>} : vector<128x128xf32>, vector<128x128xf32>, vector<128x128xf32> -> vector<128x128xf32>
    %c0_9 = arith.constant 0 : index
    %c0_10 = arith.constant 0 : index
    %10 = vector.load %arg5[%c0_9, %c0_10] : memref<1x128xf32, #tpu.memory_space<vmem>>, vector<1x128xf32>
    %11 = vector.broadcast %10 : vector<1x128xf32> to vector<128x128xf32>
    %12 = arith.addf %9, %11 : vector<128x128xf32>
    %cst_11 = arith.constant 0.000000e+00 : f32
    %13 = vector.broadcast %cst_11 : f32 to vector<128x128xf32>
    %14 = arith.maximumf %12, %13 : vector<128x128xf32>
    %c0_12 = arith.constant 0 : index
    %c0_13 = arith.constant 0 : index
    %15 = vector.load %arg6[%c0_12, %c0_13] : memref<1x128xf32, #tpu.memory_space<vmem>>, vector<1x128xf32>
    %16 = vector.broadcast %15 : vector<1x128xf32> to vector<128x128xf32>
    %17 = arith.mulf %14, %16 : vector<128x128xf32>
    %18 = vector.shape_cast %17 : vector<128x128xf32> to vector<1x128x128xf32>
    %cst_14 = arith.constant dense<0.000000e+00> : vector<1x128xf32>
    %19 = vector.multi_reduction <add>, %18, %cst_14 [2] : vector<1x128x128xf32> to vector<1x128xf32>
    %c0_15 = arith.constant 0 : index
    %c0_16 = arith.constant 0 : index
    %20 = memref.load %arg7[%c0_15, %c0_16] : memref<1x1xf32, #tpu.memory_space<smem>>
    %21 = vector.broadcast %20 : f32 to vector<1x128xf32>
    %22 = arith.addf %19, %21 : vector<1x128xf32>
    %23 = vector.shape_cast %22 : vector<1x128xf32> to vector<1x1x128xf32>
    %c0_17 = arith.constant 0 : index
    %c0_18 = arith.constant 0 : index
    %c0_19 = arith.constant 0 : index
    %24 = vector.load %arg8[%c0_17, %c0_18, %c0_19] : memref<1x1x128xf32, #tpu.memory_space<vmem>>, vector<1x1x128xf32>
    tpu.vector_store %arg8[%c0_17, %c0_18, %c0_19], %23 {strides = array<i32>} : memref<1x1x128xf32, #tpu.memory_space<vmem>>, vector<1x1x128xf32>,
    return
  }
  func.func @transform_0(%arg0: i32) -> (i32, i32) {
    %c0_i32 = arith.constant 0 : i32
    %c0_i32_0 = arith.constant 0 : i32
    return %arg0, %c0_i32 : i32, i32
  }
  func.func @transform_1(%arg0: i32) -> (i32, i32) {
    %c0_i32 = arith.constant 0 : i32
    %c0_i32_0 = arith.constant 0 : i32
    %c0_i32_1 = arith.constant 0 : i32
    return %c0_i32, %c0_i32_0 : i32, i32
  }
  func.func @transform_2(%arg0: i32) -> (i32, i32) {
    %c0_i32 = arith.constant 0 : i32
    %c0_i32_0 = arith.constant 0 : i32
    %c0_i32_1 = arith.constant 0 : i32
    return %c0_i32, %c0_i32_0 : i32, i32
  }
  func.func @transform_3(%arg0: i32) -> (i32, i32) {
    %c0_i32 = arith.constant 0 : i32
    %c0_i32_0 = arith.constant 0 : i32
    %c0_i32_1 = arith.constant 0 : i32
    return %c0_i32, %c0_i32_0 : i32, i32
  }
  func.func @transform_4(%arg0: i32) -> (i32, i32) {
    %c0_i32 = arith.constant 0 : i32
    %c0_i32_0 = arith.constant 0 : i32
    %c0_i32_1 = arith.constant 0 : i32
    return %c0_i32, %c0_i32_0 : i32, i32
  }
  func.func @transform_5(%arg0: i32) -> (i32, i32) {
    %c0_i32 = arith.constant 0 : i32
    %c0_i32_0 = arith.constant 0 : i32
    %c0_i32_1 = arith.constant 0 : i32
    return %c0_i32, %c0_i32_0 : i32, i32
  }
  func.func @transform_6(%arg0: i32) -> (i32, i32) {
    %c0_i32 = arith.constant 0 : i32
    %c0_i32_0 = arith.constant 0 : i32
    %c0_i32_1 = arith.constant 0 : i32
    return %c0_i32, %c0_i32_0 : i32, i32
  }
  func.func @transform_7(%arg0: i32) -> (i32, i32, i32) {
    %c0_i32 = arith.constant 0 : i32
    %c0_i32_0 = arith.constant 0 : i32
    %c0_i32_1 = arith.constant 0 : i32
    return %arg0, %c0_i32, %c0_i32_0 : i32, i32, i32
  }
}

</mosaic_0001>

<bundles_post_ra>
// kernel: tpu_custom_call.1
= control target key start
LH: loop header
LB: loop body
LE: loop exit
PB: predicated region body
PF: predicated region fallthrough
CT: control target
= control target key end

     0   :  { %vm99_vm0 = vcmask 1043456   ;;  %vm50_vm1 = vcmask 97280   ;;  %s789_s0 = inlined_call_operand.vmem [shape: f32[128,12], index: 0, kind: input, shape index: {}]   ;;  %s790_s1 = inlined_call_operand.vmem [shape: f32[12,128], index: 1, kind: input, shape index: {}]   ;;  %s791_s2 = inlined_call_operand.vmem [shape: f32[1,128], index: 2, kind: input, shape index: {}]   ;;  %s792_s3 = inlined_call_operand.vmem [shape: f32[128,128], index: 3, kind: input, shape index: {}]   ;;  %s793_s4 = inlined_call_operand.vmem [shape: f32[1,128], index: 4, kind: input, shape index: {}]   ;;  %s794_s5 = inlined_call_operand.vmem [shape: f32[1,128], index: 5, kind: input, shape index: {}]   ;;  %s795_s6 = inlined_call_operand.<no memory space> [shape: f32[1,1], index: 6, kind: input, shape index: {}]   ;;  %s796_s7 = inlined_call_operand.hbm [shape: f32[1,1,128], index: 7, kind: output, shape index: {}]  }
   0x1   :  { %v45_v0 = vld [vmem:[%s790_s1 + $0x8] sm:$0xf]  ;;  %v44_v1 = vld [vmem:[%s790_s1] sm:$0xff] }
   0x2   :  { %452 = vmatpush.msk.msra.mxu0 %vm99_vm0, %v45_v0  ;;  %v28_v2 = vld [vmem:[%s789_s0] sm:$0xff]  ;;  %469 = vmatpush.msk.msra.mxu3 %vm99_vm0, %v45_v0 }
   0x4   :  { %118 = vmatpush.msra.mxu0 %v44_v1  ;;  %470 = vmatpush.msra.mxu3 %v44_v1 }
   0x5   :  { %13 = vsyncpa [#allocation4], 0  ;;  %453 = vmatmul.msk.f32.vlgmr.msra.gmra.mxu0 %vm50_vm1, %v28_v2  ;;  %v29_v3 = vld [vmem:[%s789_s0 + $0x8] sm:$0xff]  ;;  %v30_v4 = vld [vmem:[%s789_s0 + $0x10] sm:$0xff]  ;;  %vm376_vm2 = vcmask 130112   ;;  %vm380_vm3 = vcmask 195712  }
   0x6   :  { %v31_v5 = vld [vmem:[%s789_s0 + $0x18] sm:$0xff]  ;;  %v38_v6 = vld [vmem:[%s789_s0 + $0x50] sm:$0xff]  ;;  %v32_v7 = vld [vmem:[%s789_s0 + $0x20] sm:$0xff]  ;;  %vm384_vm4 = vcmask 261312   ;;  %vm388_vm5 = vcmask 326912   ;;  %vm392_vm6 = vcmask 392512  }
   0x7   :  { %463 = vmatmul.msk.f32.vlgmr.msra.gmra.mxu3 %vm50_vm1, %v38_v6  ;;  %v39_v8 = vld [vmem:[%s789_s0 + $0x58] sm:$0xff]  ;;  %v33_v9 = vld [vmem:[%s789_s0 + $0x28] sm:$0xff]  ;;  %v40_v10 = vld [vmem:[%s789_s0 + $0x60] sm:$0xff]  ;;  %vm396_vm7 = vcmask 458112   ;;  %vm400_vm8 = vcmask 523712   ;;  %vm404_vm9 = vcmask 589312  }
   0x8   :  { %v199_v11 = vld [vmem:[%s792_s3 + $0x78] sm:$0xff]  ;;  %v198_v12 = vld [vmem:[%s792_s3 + $0x70] sm:$0xff]  ;;  %v197_v13 = vld [vmem:[%s792_s3 + $0x68] sm:$0xff]  ;;  %vm408_vm10 = vcmask 654912   ;;  %vm412_vm11 = vcmask 720512   ;;  %vm416_vm12 = vcmask 786112  }
   0x9   :  { %204 = vmatpush.msra.mxu1 %v199_v11  ;;  %471 = vmatpush.msra.mxu2 %v199_v11  ;;  %v34_v14 = vld [vmem:[%s789_s0 + $0x30] sm:$0xff]  ;;  %v196_v15 = vld [vmem:[%s792_s3 + $0x60] sm:$0xff]  ;;  %v41_v16 = vld [vmem:[%s789_s0 + $0x68] sm:$0xff]  ;;  %vm420_vm13 = vcmask 851712   ;;  %vm424_vm14 = vcmask 917312   ;;  %vm428_vm15 = vcmask 982912  }
   0xa   :  { %472 = vmatpush.msrb.mxu3 %v199_v11  ;;  %v195_v17 = vld [vmem:[%s792_s3 + $0x58] sm:$0xff]  ;;  %v194_v18 = vld [vmem:[%s792_s3 + $0x50] sm:$0xff]  ;;  %v193_v19 = vld [vmem:[%s792_s3 + $0x48] sm:$0xff]  ;;  %s443_s26 = sshll.u32 %s796_s7, 4  ;;  %vm432_vm0 = vcmask 1048512   ;;  %s444_s26 = int_to_ptr.hbm [resolvable:$true] %s443_s26 }
   0xb   :  { %205 = vmatpush.msra.mxu1 %v198_v12  ;;  %473 = vmatpush.msra.mxu2 %v198_v12  ;;  %v35_v20 = vld [vmem:[%s789_s0 + $0x38] sm:$0xff]  ;;  %v192_v21 = vld [vmem:[%s792_s3 + $0x40] sm:$0xff]  ;;  %v42_v22 = vld [vmem:[%s789_s0 + $0x70] sm:$0xff] }
   0xc   :  { %474 = vmatpush.msrb.mxu3 %v198_v12  ;;  %v191_v23 = vld [vmem:[%s792_s3 + $0x38] sm:$0xff]  ;;  %v190_v24 = vld [vmem:[%s792_s3 + $0x30] sm:$0xff]  ;;  %v189_v25 = vld [vmem:[%s792_s3 + $0x28] sm:$0xff] }
   0xd   :  { %454 = vmatmul.msk.f32.gmra.mxu0 %vm50_vm1, %v29_v3  ;;  %206 = vmatpush.msra.mxu1 %v197_v13  ;;  %v36_v26 = vld [vmem:[%s789_s0 + $0x40] sm:$0xff]  ;;  %v43_v28 = vld [vmem:[%s789_s0 + $0x78] sm:$0xff]  ;;  %v37_v30 = vld [vmem:[%s789_s0 + $0x48] sm:$0xff] }
   0xe   :  { %475 = vmatpush.msra.mxu2 %v197_v13  ;;  %476 = vmatpush.msrb.mxu3 %v197_v13  ;;  %v188_v27 = vld [vmem:[%s792_s3 + $0x20] sm:$0xff]  ;;  %v187_v29 = vld [vmem:[%s792_s3 + $0x18] sm:$0xff]  ;;  %v186_v31 = vld [vmem:[%s792_s3 + $0x10] sm:$0xff] }
   0xf   :  { %464 = vmatmul.msk.f32.gmra.mxu3 %vm50_vm1, %v39_v8  ;;  %207 = vmatpush.msra.mxu1 %v196_v15  ;;  %v185_v32 = vld [vmem:[%s792_s3 + $0x8] sm:$0xff]  ;;  %v184_v33 = vld [vmem:[%s792_s3] sm:$0xff] }
  0x10   :  { %477 = vmatpush.msra.mxu2 %v196_v15  ;;  %478 = vmatpush.msrb.mxu3 %v196_v15  ;;  %v504_v34 = vld [vmem:[%s791_s2] ss:$0 sm:$0xff] }
  0x11   :  { %208 = vmatpush.msra.mxu1 %v195_v17 }
  0x12   :  { %479 = vmatpush.msra.mxu2 %v195_v17  ;;  %480 = vmatpush.msrb.mxu3 %v195_v17 }
  0x13   :  { %209 = vmatpush.msra.mxu1 %v194_v18 }
  0x14   :  { %481 = vmatpush.msra.mxu2 %v194_v18  ;;  %482 = vmatpush.msrb.mxu3 %v194_v18 }
  0x15   :  { %455 = vmatmul.msk.f32.gmra.mxu0 %vm50_vm1, %v30_v4  ;;  %210 = vmatpush.msra.mxu1 %v193_v19 }
  0x16   :  { %483 = vmatpush.msra.mxu2 %v193_v19  ;;  %484 = vmatpush.msrb.mxu3 %v193_v19  ;;  %v698_v19 = vld [vmem:[%s793_s4] ss:$0 sm:$0xff] }
  0x17   :  { %465 = vmatmul.msk.f32.gmra.mxu3 %vm50_vm1, %v40_v10  ;;  %211 = vmatpush.msra.mxu1 %v192_v21 }
  0x18   :  { %485 = vmatpush.msra.mxu2 %v192_v21  ;;  %486 = vmatpush.msrb.mxu3 %v192_v21 }
  0x19   :  { %212 = vmatpush.msra.mxu1 %v191_v23 }
  0x1a   :  { %487 = vmatpush.msra.mxu2 %v191_v23  ;;  %488 = vmatpush.msrb.mxu3 %v191_v23 }
  0x1b   :  { %213 = vmatpush.msra.mxu1 %v190_v24 }
  0x1c   :  { %489 = vmatpush.msra.mxu2 %v190_v24  ;;  %490 = vmatpush.msrb.mxu3 %v190_v24 }
  0x1d   :  { %456 = vmatmul.msk.f32.gmra.mxu0 %vm50_vm1, %v31_v5  ;;  %214 = vmatpush.msra.mxu1 %v189_v25 }
  0x1e   :  { %491 = vmatpush.msra.mxu2 %v189_v25  ;;  %492 = vmatpush.msrb.mxu3 %v189_v25 }
  0x1f   :  { %466 = vmatmul.msk.f32.gmra.mxu3 %vm50_vm1, %v41_v16  ;;  %215 = vmatpush.msra.mxu1 %v188_v27 }
  0x20   :  { %493 = vmatpush.msra.mxu2 %v188_v27  ;;  %494 = vmatpush.msrb.mxu3 %v188_v27 }
  0x21   :  { %216 = vmatpush.msra.mxu1 %v187_v29 }
  0x22   :  { %495 = vmatpush.msra.mxu2 %v187_v29  ;;  %496 = vmatpush.msrb.mxu3 %v187_v29 }
  0x23   :  { %217 = vmatpush.msra.mxu1 %v186_v31 }
  0x24   :  { %497 = vmatpush.msra.mxu2 %v186_v31  ;;  %498 = vmatpush.msrb.mxu3 %v186_v31 }
  0x25   :  { %457 = vmatmul.msk.f32.gmra.mxu0 %vm50_vm1, %v32_v7  ;;  %218 = vmatpush.msra.mxu1 %v185_v32 }
  0x26   :  { %499 = vmatpush.msra.mxu2 %v185_v32  ;;  %500 = vmatpush.msrb.mxu3 %v185_v32 }
  0x27   :  { %467 = vmatmul.msk.f32.gmra.mxu3 %vm50_vm1, %v42_v22  ;;  %219 = vmatpush.msra.mxu1 %v184_v33  ;;  %v704_v22 = vld [vmem:[%s794_s5] ss:$0 sm:$0xff] }
  0x28   :  { %501 = vmatpush.msra.mxu2 %v184_v33  ;;  %502 = vmatpush.msrb.mxu3 %v184_v33 }
  0x2d   :  { %458 = vmatmul.msk.f32.gmra.mxu0 %vm50_vm1, %v33_v9 }
  0x2f   :  { %468 = vmatmul.msk.f32.gmra.mxu3 %vm50_vm1, %v43_v28 }
  0x35   :  { %459 = vmatmul.msk.f32.gmra.mxu0 %vm50_vm1, %v34_v14 }
  0x3d   :  { %460 = vmatmul.msk.f32.gmra.mxu0 %vm50_vm1, %v35_v20 }
  0x45   :  { %461 = vmatmul.msk.f32.gmra.mxu0 %vm50_vm1, %v36_v26 }
  0x4d   :  { %462 = vmatmul.msk.f32.gmra.mxu0 %vm50_vm1, %v37_v30 }
  0x82   :  { %v120_v35 = vpop.f32.mrf.mxu0 }
  0x83   :  { %v121_v36 = vadd.f32 %v504_v34, %v120_v35 }
  0x85   :  { %v168_v37 = vmax.f32 %v121_v36, 0.0 }
  0x87   :  { %220 = vmatmul.f32.vlgmr.msra.gmra.mxu1 %v168_v37 }
  0x8a   :  { %v123_v38 = vpop.f32.mrf.mxu0  ;;  %v150_v49 = vpop.f32.mrf.mxu3 }
  0x8b   :  { %v124_v39 = vadd.f32 %v504_v34, %v123_v38  ;;  %v151_v11 = vadd.f32 %v504_v34, %v150_v49 }
  0x8d   :  { %v169_v40 = vmax.f32 %v124_v39, 0.0  ;;  %v178_v12 = vmax.f32 %v151_v11, 0.0 }
  0x8f   :  { %223 = vmatmul.f32.gmra.mxu1 %v169_v40 }
  0x92   :  { %v126_v41 = vpop.f32.mrf.mxu0  ;;  %v153_v53 = vpop.f32.mrf.mxu3 }
  0x93   :  { %v127_v42 = vadd.f32 %v504_v34, %v126_v41  ;;  %v154_v13 = vadd.f32 %v504_v34, %v153_v53 }
  0x95   :  { %v170_v43 = vmax.f32 %v127_v42, 0.0  ;;  %v179_v14 = vmax.f32 %v154_v13, 0.0 }
  0x97   :  { %226 = vmatmul.f32.gmra.mxu1 %v170_v43 }
  0x9a   :  { %v129_v44 = vpop.f32.mrf.mxu0  ;;  %v156_v57 = vpop.f32.mrf.mxu3 }
  0x9b   :  { %v130_v45 = vadd.f32 %v504_v34, %v129_v44  ;;  %v157_v15 = vadd.f32 %v504_v34, %v156_v57 }
  0x9d   :  { %v171_v46 = vmax.f32 %v130_v45, 0.0  ;;  %v180_v16 = vmax.f32 %v157_v15, 0.0 }
  0x9f   :  { %229 = vmatmul.f32.gmra.mxu1 %v171_v46 }
  0xa2   :  { %v132_v47 = vpop.f32.mrf.mxu0  ;;  %v159_v61 = vpop.f32.mrf.mxu3 }
  0xa3   :  { %v133_v48 = vadd.f32 %v504_v34, %v132_v47  ;;  %v160_v17 = vadd.f32 %v504_v34, %v159_v61 }
  0xa5   :  { %v172_v50 = vmax.f32 %v133_v48, 0.0  ;;  %v181_v18 = vmax.f32 %v160_v17, 0.0 }
  0xa7   :  { %232 = vmatmul.f32.gmra.mxu1 %v172_v50 }
  0xaa   :  { %v135_v51 = vpop.f32.mrf.mxu0  ;;  %v162_v1 = vpop.f32.mrf.mxu3 }
  0xab   :  { %v136_v52 = vadd.f32 %v504_v34, %v135_v51  ;;  %v163_v3 = vadd.f32 %v504_v34, %v162_v1 }
  0xad   :  { %v173_v54 = vmax.f32 %v136_v52, 0.0  ;;  %v182_v4 = vmax.f32 %v163_v3, 0.0 }
  0xaf   :  { %235 = vmatmul.f32.gmra.mxu1 %v173_v54  ;;  %262 = vmatmul.f32.vlgmr.msrb.gmra.mxu3 %v182_v4 }
  0xb2   :  { %v138_v55 = vpop.f32.mrf.mxu0  ;;  %v165_v7 = vpop.f32.mrf.mxu3 }
  0xb3   :  { %v139_v56 = vadd.f32 %v504_v34, %v138_v55  ;;  %v166_v9 = vadd.f32 %v504_v34, %v165_v7 }
  0xb5   :  { %v174_v58 = vmax.f32 %v139_v56, 0.0  ;;  %v183_v10 = vmax.f32 %v166_v9, 0.0 }
  0xb7   :  { %238 = vmatmul.f32.gmra.mxu1 %v174_v58  ;;  %265 = vmatmul.f32.gmra.mxu3 %v183_v10 }
  0xba   :  { %v141_v59 = vpop.f32.mrf.mxu0 }
  0xbb   :  { %v142_v60 = vadd.f32 %v504_v34, %v141_v59 }
  0xbd   :  { %v175_v62 = vmax.f32 %v142_v60, 0.0 }
  0xbf   :  { %241 = vmatmul.f32.vlgmr.msra.gmra.mxu2 %v175_v62 }
  0xc2   :  { %v144_v63 = vpop.f32.mrf.mxu0 }
  0xc3   :  { %v145_v0 = vadd.f32 %v504_v34, %v144_v63 }
  0xc5   :  { %v176_v2 = vmax.f32 %v145_v0, 0.0 }
  0xc7   :  { %244 = vmatmul.f32.gmra.mxu2 %v176_v2 }
  0xca   :  { %v147_v5 = vpop.f32.mrf.mxu0 }
  0xcb   :  { %v148_v6 = vadd.f32 %v504_v34, %v147_v5 }
  0xcd   :  { %v177_v8 = vmax.f32 %v148_v6, 0.0 }
  0xcf   :  { %247 = vmatmul.f32.gmra.mxu2 %v177_v8 }
  0xd7   :  { %250 = vmatmul.f32.gmra.mxu2 %v178_v12 }
  0xdf   :  { %253 = vmatmul.f32.gmra.mxu2 %v179_v14 }
  0xe7   :  { %256 = vmatmul.f32.gmra.mxu2 %v180_v16 }
  0xef   :  { %259 = vmatmul.f32.gmra.mxu2 %v181_v18 }
 0x104   :  { %v221_v20 = vpop.f32.mrf.mxu1 }
 0x105   :  { %v222_v21 = vadd.f32 %v698_v19, %v221_v20 }
 0x107   :  { %v269_v23 = vmax.f32 %v222_v21, 0.0 }
 0x109   :  { %v289_v24 = vmul.f32 %v704_v22, %v269_v23 }
 0x10b   :  { %305 = vadd.xlane.f32.xlu0 %v289_v24 }
 0x10c   :  { %v224_v25 = vpop.f32.mrf.mxu1 }
 0x10d   :  { %v225_v26 = vadd.f32 %v698_v19, %v224_v25 }
 0x10f   :  { %v270_v27 = vmax.f32 %v225_v26, 0.0 }
 0x111   :  { %v290_v28 = vmul.f32 %v704_v22, %v270_v27 }
 0x113   :  { %307 = vadd.xlane.f32.xlu0 %v290_v28 }
 0x114   :  { %v227_v29 = vpop.f32.mrf.mxu1 }
 0x115   :  { %v228_v30 = vadd.f32 %v698_v19, %v227_v29 }
 0x117   :  { %v271_v31 = vmax.f32 %v228_v30, 0.0  ;;  %v371_v30 = vlaneseq }
 0x119   :  { %v291_v32 = vmul.f32 %v704_v22, %v271_v31  ;;  %v737_v31 = vand.u32 127, %v371_v30 }
 0x11b   :  { %309 = vadd.xlane.f32.xlu1 %v291_v32 }
 0x11c   :  { %v230_v33 = vpop.f32.mrf.mxu1 }
 0x11d   :  { %v231_v34 = vadd.f32 %v698_v19, %v230_v33 }
 0x11f   :  { %v272_v35 = vmax.f32 %v231_v34, 0.0 }
 0x121   :  { %v292_v36 = vmul.f32 %v704_v22, %v272_v35 }
 0x123   :  { %311 = vadd.xlane.f32.xlu1 %v292_v36 }
 0x124   :  { %v233_v37 = vpop.f32.mrf.mxu1 }
 0x125   :  { %v234_v38 = vadd.f32 %v698_v19, %v233_v37  ;;  %v378_v37 = vadd.s32 4294967280, %v737_v31 }
 0x127   :  { %v273_v39 = vmax.f32 %v234_v38, 0.0 }
 0x129   :  { %v293_v40 = vmul.f32 %v704_v22, %v273_v39 }
 0x12b   :  { %313 = vadd.xlane.f32.xlu2 %v293_v40  ;;  %v382_v40 = vadd.s32 4294967272, %v737_v31 }
 0x12c   :  { %v236_v41 = vpop.f32.mrf.mxu1 }
 0x12d   :  { %v237_v42 = vadd.f32 %v698_v19, %v236_v41 }
 0x12f   :  { %v274_v43 = vmax.f32 %v237_v42, 0.0  ;;  %v386_v42 = vadd.s32 4294967264, %v737_v31 }
 0x131   :  { %v294_v44 = vmul.f32 %v704_v22, %v274_v43 }
 0x132   :  { %v263_v1 = vpop.f32.mrf.mxu3 }
 0x133   :  { %315 = vadd.xlane.f32.xlu2 %v294_v44  ;;  %v264_v5 = vadd.f32 %v698_v19, %v263_v1  ;;  %v410_v1 = vadd.s32 4294967216, %v737_v31 }
 0x134   :  { %v239_v45 = vpop.f32.mrf.mxu1 }
 0x135   :  { %v240_v46 = vadd.f32 %v698_v19, %v239_v45  ;;  %v283_v7 = vmax.f32 %v264_v5, 0.0  ;;  %v414_v5 = vadd.s32 4294967208, %v737_v31 }
 0x137   :  { %v275_v47 = vmax.f32 %v240_v46, 0.0  ;;  %v303_v12 = vmul.f32 %v704_v22, %v283_v7  ;;  %v390_v46 = vadd.s32 4294967256, %v737_v31 }
 0x139   :  { %v295_v48 = vmul.f32 %v704_v22, %v275_v47 }
 0x13a   :  { %v266_v9 = vpop.f32.mrf.mxu3 }
 0x13b   :  { %317 = vadd.xlane.f32.xlu0 %v295_v48  ;;  %v267_v13 = vadd.f32 %v698_v19, %v266_v9  ;;  %v418_v9 = vadd.s32 4294967200, %v737_v31 }
 0x13d   :  { %v284_v15 = vmax.f32 %v267_v13, 0.0 }
 0x13f   :  { %v304_v20 = vmul.f32 %v704_v22, %v284_v15 }
 0x142   :  { %v242_v49 = vpop.f32.mrf.mxu2 }
 0x143   :  { %v243_v50 = vadd.f32 %v698_v19, %v242_v49  ;;  %v394_v49 = vadd.s32 4294967248, %v737_v31 }
 0x145   :  { %v276_v51 = vmax.f32 %v243_v50, 0.0 }
 0x147   :  { %v296_v52 = vmul.f32 %v704_v22, %v276_v51 }
 0x149   :  { %319 = vadd.xlane.f32.xlu1 %v296_v52 }
 0x14a   :  { %v245_v53 = vpop.f32.mrf.mxu2 }
 0x14b   :  { %v246_v54 = vadd.f32 %v698_v19, %v245_v53  ;;  %v398_v53 = vadd.s32 4294967240, %v737_v31 }
 0x14d   :  { %v277_v55 = vmax.f32 %v246_v54, 0.0 }
 0x14f   :  { %v297_v56 = vmul.f32 %v704_v22, %v277_v55 }
 0x151   :  { %321 = vadd.xlane.f32.xlu2 %v297_v56 }
 0x152   :  { %v248_v57 = vpop.f32.mrf.mxu2 }
 0x153   :  { %v249_v58 = vadd.f32 %v698_v19, %v248_v57  ;;  %v402_v57 = vadd.s32 4294967232, %v737_v31 }
 0x155   :  { %v278_v59 = vmax.f32 %v249_v58, 0.0 }
 0x157   :  { %v298_v60 = vmul.f32 %v704_v22, %v278_v59 }
 0x159   :  { %323 = vadd.xlane.f32.xlu0 %v298_v60 }
 0x15a   :  { %v251_v61 = vpop.f32.mrf.mxu2 }
 0x15b   :  { %v252_v62 = vadd.f32 %v698_v19, %v251_v61 }
 0x15d   :  { %v279_v63 = vmax.f32 %v252_v62, 0.0  ;;  %v406_v62 = vadd.s32 4294967224, %v737_v31 }
 0x15f   :  { %v299_v0 = vmul.f32 %v704_v22, %v279_v63 }
 0x161   :  { %325 = vadd.xlane.f32.xlu1 %v299_v0 }
 0x162   :  { %v254_v2 = vpop.f32.mrf.mxu2 }
 0x163   :  { %v255_v3 = vadd.f32 %v698_v19, %v254_v2 }
 0x165   :  { %v280_v4 = vmax.f32 %v255_v3, 0.0 }
 0x167   :  { %v300_v6 = vmul.f32 %v704_v22, %v280_v4 }
 0x169   :  { %327 = vadd.xlane.f32.xlu2 %v300_v6 }
 0x16a   :  { %v257_v8 = vpop.f32.mrf.mxu2 }
 0x16b   :  { %v258_v10 = vadd.f32 %v698_v19, %v257_v8 }
 0x16d   :  { %v281_v11 = vmax.f32 %v258_v10, 0.0 }
 0x16f   :  { %v301_v14 = vmul.f32 %v704_v22, %v281_v11 }
 0x171   :  { %329 = vadd.xlane.f32.xlu0 %v301_v14  ;;  %333 = vadd.xlane.f32.xlu2 %v303_v12 }
 0x172   :  { %v260_v16 = vpop.f32.mrf.mxu2 }
 0x173   :  { %v261_v17 = vadd.f32 %v698_v19, %v260_v16  ;;  %v742_v19 = vstv %s795_s6  ;;  %s533_s6 = smov [#allocation3]  }
 0x174   :  { %s441_s23 = sshll.u32 %s533_s6, 4  ;;  %s442_s23 = int_to_ptr.vmem [resolvable:$true] %s441_s23 }
 0x175   :  { %v282_v18 = vmax.f32 %v261_v17, 0.0 }
 0x177   :  { %v302_v21 = vmul.f32 %v704_v22, %v282_v18  ;;  %v374_v22 = vadd.s32 4294967288, %v737_v31  ;;  %v422_v18 = vadd.s32 4294967192, %v737_v31 }
 0x179   :  { %331 = vadd.xlane.f32.xlu1 %v302_v21  ;;  %335 = vadd.xlane.f32.xlu0 %v304_v20  ;;  %v430_v20 = vadd.s32 4294967176, %v737_v31 }
 0x17e   :  { %v306_v23 = vpop.xlane.xlu0 %305 }
 0x17f   :  { %v339_v36 = vadd.f32 %v742_v19, %v306_v23 }
 0x181   :  { %v373_v44 = vperm.slane %v339_v36, %v737_v31 }
 0x186   :  { %v308_v26 = vpop.xlane.xlu0 %307 }
 0x187   :  { %v340_v33 = vadd.f32 %v742_v19, %v308_v26 }
 0x189   :  { %v375_v39 = vperm.slane %v340_v33, %v374_v22 }
 0x18b   :  { %v377_v51 = vsel %vm376_vm2, %v375_v39, %v373_v44 }
 0x18e   :  { %v310_v25 = vpop.xlane.xlu1 %309 }
 0x18f   :  { %v341_v38 = vadd.f32 %v742_v19, %v310_v25 }
 0x191   :  { %v379_v45 = vperm.slane %v341_v38, %v378_v37 }
 0x193   :  { %v381_v60 = vsel %vm380_vm3, %v379_v45, %v377_v51 }
 0x196   :  { %v312_v28 = vpop.xlane.xlu1 %311 }
 0x197   :  { %v342_v41 = vadd.f32 %v742_v19, %v312_v28 }
 0x199   :  { %v383_v52 = vperm.slane %v342_v41, %v382_v40 }
 0x19b   :  { %v385_v3 = vsel %vm384_vm4, %v383_v52, %v381_v60 }
 0x19e   :  { %v314_v24 = vpop.xlane.xlu2 %313 }
 0x19f   :  { %v343_v43 = vadd.f32 %v742_v19, %v314_v24  ;;  %v426_v24 = vadd.s32 4294967184, %v737_v31 }
 0x1a1   :  { %v387_v56 = vperm.slane %v343_v43, %v386_v42 }
 0x1a3   :  { %v389_v7 = vsel %vm388_vm5, %v387_v56, %v385_v3 }
 0x1a6   :  { %v316_v27 = vpop.xlane.xlu2 %315 }
 0x1a7   :  { %v344_v47 = vadd.f32 %v742_v19, %v316_v27 }
 0x1a9   :  { %v391_v61 = vperm.slane %v344_v47, %v390_v46 }
 0x1ab   :  { %v393_v11 = vsel %vm392_vm6, %v391_v61, %v389_v7 }
 0x1ae   :  { %v318_v29 = vpop.xlane.xlu0 %317 }
 0x1af   :  { %v345_v50 = vadd.f32 %v742_v19, %v318_v29 }
 0x1b1   :  { %v395_v0 = vperm.slane %v345_v50, %v394_v49 }
 0x1b3   :  { %v397_v14 = vsel %vm396_vm7, %v395_v0, %v393_v11 }
 0x1bc   :  { %v320_v34 = vpop.xlane.xlu1 %319 }
 0x1bd   :  { %v346_v54 = vadd.f32 %v742_v19, %v320_v34 }
 0x1bf   :  { %v399_v4 = vperm.slane %v346_v54, %v398_v53 }
 0x1c1   :  { %v401_v16 = vsel %vm400_vm8, %v399_v4, %v397_v14 }
 0x1c4   :  { %v322_v32 = vpop.xlane.xlu2 %321 }
 0x1c5   :  { %v347_v58 = vadd.f32 %v742_v19, %v322_v32 }
 0x1c7   :  { %v403_v8 = vperm.slane %v347_v58, %v402_v57 }
 0x1c9   :  { %v405_v21 = vsel %vm404_vm9, %v403_v8, %v401_v16 }
 0x1cc   :  { %v324_v35 = vpop.xlane.xlu0 %323 }
 0x1cd   :  { %v348_v63 = vadd.f32 %v742_v19, %v324_v35 }
 0x1cf   :  { %v407_v12 = vperm.slane %v348_v63, %v406_v62 }
 0x1d1   :  { %v409_v28 = vsel %vm408_vm10, %v407_v12, %v405_v21 }
 0x1d4   :  { %v326_v55 = vpop.xlane.xlu1 %325 }
 0x1d5   :  { %v349_v2 = vadd.f32 %v742_v19, %v326_v55 }
 0x1d7   :  { %v411_v15 = vperm.slane %v349_v2, %v410_v1 }
 0x1d9   :  { %v413_v32 = vsel %vm412_vm11, %v411_v15, %v409_v28 }
 0x1dc   :  { %v328_v48 = vpop.xlane.xlu2 %327 }
 0x1dd   :  { %v350_v6 = vadd.f32 %v742_v19, %v328_v48 }
 0x1df   :  { %v415_v17 = vperm.slane %v350_v6, %v414_v5 }
 0x1e1   :  { %v417_v22 = vsel %vm416_vm12, %v415_v17, %v413_v32 }
 0x1e4   :  { %v330_v59 = vpop.xlane.xlu0 %329  ;;  %v334_v13 = vpop.xlane.xlu2 %333 }
 0x1e5   :  { %v351_v10 = vadd.f32 %v742_v19, %v330_v59  ;;  %v353_v25 = vadd.f32 %v742_v19, %v334_v13 }
 0x1e7   :  { %v419_v23 = vperm.slane %v351_v10, %v418_v9  ;;  %v427_v35 = vperm.slane %v353_v25, %v426_v24 }
 0x1e9   :  { %v421_v31 = vsel %vm420_vm13, %v419_v23, %v417_v22 }
 0x1ec   :  { %v332_v26 = vpop.xlane.xlu1 %331  ;;  %v336_v27 = vpop.xlane.xlu0 %335 }
 0x1ed   :  { %v352_v29 = vadd.f32 %v742_v19, %v332_v26  ;;  %v354_v30 = vadd.f32 %v742_v19, %v336_v27 }
 0x1ef   :  { %v423_v33 = vperm.slane %v352_v29, %v422_v18  ;;  %v431_v34 = vperm.slane %v354_v30, %v430_v20 }
 0x1f1   :  { %v425_v36 = vsel %vm424_vm14, %v423_v33, %v421_v31 }
 0x1f2   :  { %v429_v37 = vsel %vm428_vm15, %v427_v35, %v425_v36 }
 0x1f3   :  { %v433_v19 = vsel %vm432_vm0, %v431_v34, %v429_v37 }
 0x1f4   :  { %435 = vst [vmem:[#allocation3] sm:$0x1] %v433_v19 }
 0x1f5   :  { %446 = dma.vmem_to_hbm [thread:$0]  %s442_s23, 16, %s444_s26, [#allocation4]  }
 0x1f6   :  { %531 = dma.done.wait [#allocation4], 16  }
 0x1f7   :  { %532 = vsyncadd [#allocation4], 4294967280 }
 0x1f8   :  { %451 = vsyncpa [#allocation4], 1 }

</bundles_post_ra>
